<compile_context>
chip_gen: v7x
topology: tpu7x:2x2x1
jax: 0.10.0
libtpu: 0.0.40
codegen_flags: <defaults>
</compile_context>

<pallas_src>
import jax
import jax.numpy as jnp
from jax import lax
from jax.experimental import pallas as pl
from jax.experimental.pallas import tpu as pltpu

_LANE = 128


def _make_pos_encoding_kernel(fold: int):
    """Kernel for one (row_tile, lane_w) lane-dense block of the sinusoid table.

    Flattened element (R, c) corresponds to logical (pos, dim) with
        pos = R * fold + pos_off[c],   dim = c % d_model
    and
        table[pos, dim] = sin(pos * inv_freq[dim] + phase[dim])
    where phase[dim] = 0 for even dims (sin) and pi/2 for odd dims (cos).
    Exactly one EUP op (sin) per element; the rest is cheap VPU add/mul.
    """

    def kernel(pos_off_ref, inv_freq_ref, phase_ref, out_ref):
        tm, w = out_ref.shape
        row0 = pl.program_id(0) * tm
        # Base logical position of every flattened row (int math, one cast).
        # Note: f32 position loses integer precision beyond ~2^24 positions,
        # which is far beyond any realistic max_len for this table.
        base = fold * (row0 + lax.broadcasted_iota(jnp.int32, (tm, w), 0))
        pos = base.astype(jnp.float32) + pos_off_ref[...]
        angle = pos * inv_freq_ref[...] + phase_ref[...]
        out_ref[...] = jnp.sin(angle)

    return kernel


def _choose_row_tile(flat_rows: int, lane_w: int, max_tile_bytes: int = 8 << 20) -> int:
    """Largest row tile (multiple of 8, dividing flat_rows) under the byte cap."""
    cap = max(8, max_tile_bytes // (lane_w * 4))
    if flat_rows >= 16:
        # Keep >=2 grid steps so v7x megacore can shard the parallel axis.
        cap = min(cap, flat_rows // 2)
    if flat_rows <= cap:
        return flat_rows  # whole table in one block (block == full dim is legal)
    best = None
    t = 8
    while t <= cap:
        if flat_rows % t == 0:
            best = t
        t += 8
    return best if best is not None else flat_rows


def build_position_encoding(max_len: int, d_model: int) -> jnp.ndarray:
    """Build the full (max_len, d_model) sinusoid table with a Pallas kernel."""
    assert d_model % 2 == 0, "d_model must be even"

    # Lane-dense folding: pack `fold` consecutive positions into one 128-wide row
    # when d_model < 128 so stores use all lanes of each vreg.
    if d_model < _LANE and _LANE % d_model == 0 and max_len % (_LANE // d_model) == 0:
        fold = _LANE // d_model
    else:
        fold = 1
    lane_w = fold * d_model
    flat_rows = max_len // fold

    row_tile = _choose_row_tile(flat_rows, lane_w)
    assert flat_rows % row_tile == 0

    # Tiny per-lane constants, computed once with plain JAX (not per element).
    dim = jnp.arange(d_model, dtype=jnp.int32)
    two_i = jnp.bitwise_and(dim, -2).astype(jnp.float32)          # (dim // 2) * 2
    inv_freq_row = jnp.exp(
        -(two_i / jnp.float32(d_model)) * jnp.log(jnp.float32(10000.0)))
    phase_row = jnp.where((dim & 1) == 0, 0.0, jnp.pi / 2).astype(jnp.float32)

    inv_freq = jnp.tile(inv_freq_row, fold)[None, :]                        # (1, lane_w)
    phase = jnp.tile(phase_row, fold)[None, :]                              # (1, lane_w)
    pos_off = jnp.repeat(jnp.arange(fold, dtype=jnp.float32), d_model)[None, :]

    const_spec = pl.BlockSpec((1, lane_w), lambda i: (0, 0))

    flat = pl.pallas_call(
        _make_pos_encoding_kernel(fold),
        out_shape=jax.ShapeDtypeStruct((flat_rows, lane_w), jnp.float32),
        grid_spec=pltpu.PrefetchScalarGridSpec(
            num_scalar_prefetch=0,
            grid=(flat_rows // row_tile,),
            in_specs=[const_spec, const_spec, const_spec],
            out_specs=pl.BlockSpec((row_tile, lane_w), lambda i: (i, 0)),
        ),
        compiler_params=pltpu.CompilerParams(
            dimension_semantics=("parallel",),
            vmem_limit_bytes=32 * 1024 * 1024,   # safe on v5e/v6e/v7x
        ),
    )(pos_off, inv_freq, phase)

    return flat.reshape(max_len, d_model)


class PositionEncoding:
    """JAX/Pallas equivalent of the PyTorch PositionEncoding module."""

    def __init__(self, d_model: int, max_len: int):
        self.d_model = d_model
        self.max_len = max_len
        # Fixed (non-trainable) buffer computed once, like the PyTorch __init__.
        self.encoding = build_position_encoding(max_len, d_model)

    def __call__(self, x: jnp.ndarray) -> jnp.ndarray:
        _, seq_len = x.shape
        return self.encoding[:seq_len, :]


def _reference_encoding(max_len: int, d_model: int) -> jnp.ndarray:
    """Pure-JAX reference matching the PyTorch table construction."""
    pos = jnp.arange(max_len, dtype=jnp.float32)[:, None]
    two_i = jnp.arange(0, d_model, 2, dtype=jnp.float32)
    angle = pos / (10000.0 ** (two_i / d_model))
    enc = jnp.zeros((max_len, d_model), dtype=jnp.float32)
    enc = enc.at[:, 0::2].set(jnp.sin(angle))
    enc = enc.at[:, 1::2].set(jnp.cos(angle))
    return enc


if __name__ == "__main__":
    d_model = 32
    max_len = 64
    batch, seq_len = 2, 8

    key = jax.random.PRNGKey(0)
    # x only supplies (batch, seq_len); its contents are irrelevant to forward.
    x = jax.random.randint(key, (batch, seq_len), 0, 100, dtype=jnp.int32)

    pe = PositionEncoding(d_model=d_model, max_len=max_len)
    out = jax.block_until_ready(pe(x))

    assert out.shape == (seq_len, d_model), out.shape
    ref_full = _reference_encoding(max_len, d_model)
    assert jnp.allclose(pe.encoding, ref_full, atol=1e-4, rtol=1e-4), \
        "full table mismatch vs reference"
    assert jnp.allclose(out, ref_full[:seq_len, :], atol=1e-4, rtol=1e-4), \
        "forward slice mismatch vs reference"

    print("KERNEL_OK")
</pallas_src>

<mosaic_0001>
module attributes {stable_mosaic.version = 11 : i64} {
  func.func @kernel(%arg0: i32, %arg1: memref<1x128xf32, #tpu.memory_space<vmem>>, %arg2: memref<1x128xf32, #tpu.memory_space<vmem>>, %arg3: memref<1x128xf32, #tpu.memory_space<vmem>>, %arg4: memref<8x128xf32, #tpu.memory_space<vmem>>) attributes {dimension_semantics = [#tpu.dimension_semantics<parallel>], iteration_bounds = array<i64: 2>, scalar_prefetch = 0 : i64, scratch_operands = 0 : i64, tpu.core_type = #tpu.core_type<tc>, window_params = [{pipeline_mode = #tpu.pipeline_mode<synchronous>, transform_indices = @transform_0, window_bounds = array<i64: 1, 128>}, {pipeline_mode = #tpu.pipeline_mode<synchronous>, transform_indices = @transform_1, window_bounds = array<i64: 1, 128>}, {pipeline_mode = #tpu.pipeline_mode<synchronous>, transform_indices = @transform_2, window_bounds = array<i64: 1, 128>}, {transform_indices = @transform_3, window_bounds = array<i64: 8, 128>}]} {
    %c8_i32 = arith.constant 8 : i32
    %0 = arith.muli %arg0, %c8_i32 : i32
    %1 = tpu.iota {dimensions = array<i32: 0>} : vector<8x128xi32>
    %2 = vector.broadcast %0 : i32 to vector<8x128xi32>
    %3 = arith.addi %2, %1 : vector<8x128xi32>
    %c4_i32 = arith.constant 4 : i32
    %4 = vector.broadcast %c4_i32 : i32 to vector<8x128xi32>
    %5 = arith.muli %4, %3 : vector<8x128xi32>
    %6 = arith.sitofp %5 : vector<8x128xi32> to vector<8x128xf32>
    %c0 = arith.constant 0 : index
    %c0_0 = arith.constant 0 : index
    %7 = vector.load %arg1[%c0, %c0_0] : memref<1x128xf32, #tpu.memory_space<vmem>>, vector<1x128xf32>
    %8 = vector.broadcast %7 : vector<1x128xf32> to vector<8x128xf32>
    %9 = arith.addf %6, %8 : vector<8x128xf32>
    %c0_1 = arith.constant 0 : index
    %c0_2 = arith.constant 0 : index
    %10 = vector.load %arg2[%c0_1, %c0_2] : memref<1x128xf32, #tpu.memory_space<vmem>>, vector<1x128xf32>
    %11 = vector.broadcast %10 : vector<1x128xf32> to vector<8x128xf32>
    %12 = arith.mulf %9, %11 : vector<8x128xf32>
    %c0_3 = arith.constant 0 : index
    %c0_4 = arith.constant 0 : index
    %13 = vector.load %arg3[%c0_3, %c0_4] : memref<1x128xf32, #tpu.memory_space<vmem>>, vector<1x128xf32>
    %14 = vector.broadcast %13 : vector<1x128xf32> to vector<8x128xf32>
    %15 = arith.addf %12, %14 : vector<8x128xf32>
    %16 = math.sin %15 : vector<8x128xf32>
    %c0_5 = arith.constant 0 : index
    %c0_6 = arith.constant 0 : index
    %17 = vector.load %arg4[%c0_5, %c0_6] : memref<8x128xf32, #tpu.memory_space<vmem>>, vector<8x128xf32>
    tpu.vector_store %arg4[%c0_5, %c0_6], %16 {strides = array<i32>} : memref<8x128xf32, #tpu.memory_space<vmem>>, vector<8x128xf32>,
    return
  }
  func.func @transform_0(%arg0: i32) -> (i32, i32) {
    %c0_i32 = arith.constant 0 : i32
    %c0_i32_0 = arith.constant 0 : i32
    %c0_i32_1 = arith.constant 0 : i32
    return %c0_i32, %c0_i32_0 : i32, i32
  }
  func.func @transform_1(%arg0: i32) -> (i32, i32) {
    %c0_i32 = arith.constant 0 : i32
    %c0_i32_0 = arith.constant 0 : i32
    %c0_i32_1 = arith.constant 0 : i32
    return %c0_i32, %c0_i32_0 : i32, i32
  }
  func.func @transform_2(%arg0: i32) -> (i32, i32) {
    %c0_i32 = arith.constant 0 : i32
    %c0_i32_0 = arith.constant 0 : i32
    %c0_i32_1 = arith.constant 0 : i32
    return %c0_i32, %c0_i32_0 : i32, i32
  }
  func.func @transform_3(%arg0: i32) -> (i32, i32) {
    %c0_i32 = arith.constant 0 : i32
    %c0_i32_0 = arith.constant 0 : i32
    return %arg0, %c0_i32 : i32, i32
  }
}

</mosaic_0001>

<bundles_post_ra>
// kernel: tpu_custom_call.1
= control target key start
LH: loop header
LB: loop body
LE: loop exit
PB: predicated region body
PF: predicated region fallthrough
CT: control target
= control target key end

     0   :  { %8 = vsyncpa [#allocation3], 0  ;;  %s735_s0 = inlined_call_operand.hbm [shape: f32[1,128], index: 0, kind: input, shape index: {}]   ;;  %s736_s1 = inlined_call_operand.vmem [shape: f32[1,128], index: 1, kind: input, shape index: {}]   ;;  %s737_s2 = inlined_call_operand.vmem [shape: f32[1,128], index: 2, kind: input, shape index: {}]   ;;  %s738_s3 = inlined_call_operand.hbm [shape: f32[16,128], index: 3, kind: output, shape index: {}]  }
   0x1   :  { %9 = vsyncpa [#allocation4], 0 }
   0x2   :  { %11 = vsyncpa [#allocation4 + $0x1], 0  ;;  %s577_s12 = smov 0   ;;  %s579_s13 = smov 0  }
   0x3   :  { %s581_s14 = smov 0   ;;  %s583_s15 = smov 0  }
   0x4 LB: > { %s598_s16 = sadd.s32 4294967295, %s547_s15   ;;  %s371_s17 = sadd.s32 4294967294, %s547_s15   ;;  %s547_s15 = sphi %s583_s15, %s754_s15   ;;  %s543_s14 = sphi %s581_s14, %s753_s14   ;;  %s539_s13 = sphi %s579_s13, %s752_s13   ;;  %s535_s12 = sphi %s577_s12, %s751_s12  }
   0x5   : > { %s602_s18 = sadd.s32 1, %s547_s15   ;;  %s87_s19 = sadd.s32 1, %s543_s14 }
   0x6   : > { %s84_s20 = ssub.s32 %s547_s15, %s602_s18  ;;  %p97_p0 = scmp.ne.s32.totalorder %s543_s14, %s539_s13 }
   0x7   : > { %p85_p1 = scmp.eq.s32.totalorder %s84_s20, 0  ;;  %p98_p2 = scmp.eq.s32.totalorder %s598_s16, 1 }
   0x8   : > { %p103_p3 = scmp.ne.s32.totalorder %s539_s13, %s535_s12  ;;  %p104_p4 = scmp.eq.s32.totalorder %s371_s17, 1 }
   0x9   : > { %s613_s21 = scalar_select %p85_p1, %s543_s14, %s87_s19  }
   0xa   : > { %p615_p5 = por %p98_p2, %p97_p0  ;;  %p619_p6 = por %p104_p4, %p103_p3 }
   0xb   : > { %p372_p7 = scmp.ge.s32.totalorder %s547_s15, 1  ;;  %p111_p8 = scmp.lt.s32.totalorder %s547_s15, 3 }
   0xc   : > { %s742_s22 = scalar_select %p615_p5, 1, 0 }
   0xd   : > { %s743_s23 = scalar_select %p619_p6, 1, 0 }
   0xe   : > { %p739_p9 = scmp.eq.s32.totalorder %s598_s16, 0  ;;  %p626_p10 = pnand %p372_p7, %p111_p8 }
   0xf   : > { %s549_s25 = smov [#allocation2]   ;;  %s453_s30 = scalar_lea.hbm %s735_s0, 16 }
  0x10   : > { %s744_s24 = scalar_select %p626_p10, 1, 0 }
  0x11   : > { %s124_s26 = sshll.u32 %s549_s25, 4  ;;  %p399_p11 = pneg %p626_p10  ;;  %s125_s26 = int_to_ptr.vmem [resolvable:$true] %s124_s26 }
  0x12   : > { %p454_p13 = scmp.ne.s32.totalorder %s735_s0, %s453_s30  ;;  %p460_p3 = scmp.lt.u32.totalorder %s453_s30, %s735_s0 }
  0x13   : > { %p634_p12 = pnand %p739_p9, %p399_p11 }
  0x15   : > { %p455_p0 = pneg %p634_p12 }
  0x17   : > { %p456_p1 = pnand %p455_p0, %p454_p13 }
  0x19   : > { %p457_p2 = pneg %p456_p1 }
  0x1b   : > { %p462_p4 = pnand %p460_p3, %p457_p2 }
  0x1d   : > { %465 = shalt.err (!%p462_p4)
}
  0x1e   : > { %s466_s8 = scalar_lea.vmem %s125_s26, 16  ;;  %s473_s9 = scalar_lea.vmem %s125_s26, 32 }
  0x1f   : > { %p467_p7 = scmp.ne.s32.totalorder %s125_s26, %s466_s8  ;;  %p474_p9 = scmp.lt.s32.totalorder %s125_s26, %s125_s26 }
  0x20   : > { %p475_p6 = scmp.lt.s32.totalorder %s473_s9, %s466_s8 }
  0x21   : > { %p469_p8 = pnand %p467_p7, %p455_p0 }
  0x22   : > { %p476_p5 = por %p475_p6, %p474_p9 }
  0x23   : > { %p470_p11 = pneg %p469_p8 }
  0x25   : > { %p477_p10 = pnand %p476_p5, %p470_p11 }
  0x27   : > { %480 = shalt.err (!%p477_p10)
}
  0x28   : > { %402 = dma.hbm_to_vmem [thread:$0]  (!%p634_p12), %s735_s0, 16, %s125_s26, [#allocation3]  }
  0x29   : > { %p746_p13 = scmp.ne.s32.totalorder %s744_s24, 0 }
  0x2a   : > { %p747_p1 = scmp.eq.s32.totalorder (!%p746_p13), %s598_s16, 0 }
  0x2b   : > { %143 = sbr.rel (%p746_p13) target bundleno = 161 (0xa1), region = 32 }
  0x32   : > { %526 = dma.done.wait (%p747_p1), [#allocation3], 16   ;;  %p748_p0 = pmov %p747_p1 }
  0x33   : > { %s377_s17 = sshll.u32 %s598_s16, 3  ;;  %v163_v0 = vlaneseq  ;;  %v378_v5 = vld [vmem:[#allocation2] ss:$0 sm:$0xff]  ;;  %v550_v23 = vmov 683565275   ;;  %s159_s26 = sand.u32 1, %s539_s13  }
  0x34   : > { %528 = vsyncadd (%p748_p0), [#allocation3], 4294967280  ;;  %v165_v1 = vstv %s377_s17  ;;  %v379_v7 = vld [vmem:[%s736_s1] ss:$0 sm:$0xff]  ;;  %v551_v25 = vmov 2475754826  }
  0x35   : > { %v164_v2 = vshrl.u32 %v163_v0, 7  ;;  %v380_v9 = vld [vmem:[%s737_s2] ss:$0 sm:$0xff]  ;;  %v552_v27 = vmov 2131351028   ;;  %s376_s27 = sshll.u32 %s159_s26, 3 }
  0x36   : > { %v553_v29 = vmov 2102212464   ;;  %v554_v31 = vmov 920167782   ;;  %v555_v38 = vmov 1326507024  }
  0x37   : > { %v166_v3 = vadd.s32 %v165_v1, %v164_v2  ;;  %s161_s28 = scalar_lea.vmem [#allocation5], %s376_s27  ;;  %s386_s30 = sshll.u32 %s598_s16, 7 }
  0x38   : > { %s312_s29 = sshll.u32 %s161_s28, 4  ;;  %s695_s6 = scalar_lea.hbm %s738_s3, %s386_s30  ;;  %s690_s29 = int_to_ptr.vmem [resolvable:$true] %s312_s29 }
  0x39   : > { %v167_v4 = vmul.u32 4, %v166_v3  ;;  %s299_s7 = scalar_lea.sflag [#allocation4], %s159_s26  ;;  %s481_s8 = scalar_lea.vmem %s690_s29, 128 }
  0x3a   : > { %p482_p5 = scmp.ne.s32.totalorder %s690_s29, %s481_s8  ;;  %p749_p6 = scmp.ne.s32.totalorder %s742_s22, 0 }
  0x3b   : > { %v168_v6 = vcvt.s32.f32 %v167_v4  ;;  %s556_s16 = smov [#allocation5]  }
  0x3c   : > { %p483_p9 = pnand %p482_p5, %p749_p6  ;;  %s485_s9 = sshll.u32 %s556_s16, 4  ;;  %s486_s9 = int_to_ptr.vmem [resolvable:$false] %s485_s9 }
  0x3d   : > { %v176_v8 = vadd.f32 %v378_v5, %v168_v6  ;;  %s487_s10 = scalar_lea.vmem %s486_s9, 256  ;;  %p488_p12 = scmp.lt.s32.totalorder %s690_s29, %s486_s9 }
  0x3e   : > { %p484_p10 = pneg %p483_p9  ;;  %p489_p2 = scmp.lt.s32.totalorder %s487_s10, %s481_s8 }
  0x3f   : > { %v184_v10 = vmul.f32 %v379_v7, %v176_v8 }
  0x40   : > { %p490_p3 = por %p489_p2, %p488_p12 }
  0x41   : > { %v667_v11 = vadd.f32 %v380_v9, %v184_v10 }
  0x42   : > { %p491_p4 = pnand %p490_p3, %p484_p10 }
  0x43   : > { %v196_v12 = vand.u32 2139095040, %v667_v11  ;;  %v193_v14 = vand.u32 2147483647, %v667_v11  ;;  %vm195_vm7 = vcmp.lt.s32.totalorder %v667_v11, 0  ;;  %vm285_vm12 = vweird.f32 %v667_v11 }
  0x45   : > { %v197_v13 = vshrl.u32 %v196_v12, 23  ;;  %v200_v17 = vand.u32 8388607, %v193_v14  ;;  %vm194_vm8 = vcmp.le.f32.partialorder %v193_v14, 0.7853982 }
  0x47   : > { %v381_v15 = vadd.s32 4294967169, %v197_v13  ;;  %v201_v20 = vor.u32 8388608, %v200_v17 }
  0x49   : > { %v203_v16 = vadd.s32 1, %v381_v15  ;;  %v241_v40 = vshll.u32 %v201_v20, 8 }
  0x4b   : > { %vm204_vm0 = vcmp.gt.s32.totalorder %v203_v16, 0 }
  0x4c   : > { %v205_v18 = vsel %vm204_vm0, %v203_v16, 0 }
  0x4d   : > { %v207_v19 = vand.u32 31, %v205_v18  ;;  %v206_v21 = vshrl.u32 %v205_v18, 5 }
  0x4f   : > { %v208_v22 = vsub.s32 32, %v207_v19  ;;  %v210_v24 = vshll.u32 %v550_v23, %v207_v19  ;;  %v213_v26 = vshll.u32 %v551_v25, %v207_v19  ;;  %v216_v28 = vshll.u32 %v552_v27, %v207_v19 }
  0x50   : > { %v219_v30 = vshll.u32 %v553_v29, %v207_v19  ;;  %v222_v32 = vshll.u32 %v554_v31, %v207_v19  ;;  %vm225_vm1 = vcmp.lt.s32.totalorder %v206_v21, 1  ;;  %vm228_vm2 = vcmp.lt.s32.totalorder %v206_v21, 4 }
  0x51   : > { %v209_v33 = vshrl.u32 %v550_v23, %v208_v22  ;;  %v211_v34 = vshrl.u32 %v551_v25, %v208_v22  ;;  %v214_v35 = vshrl.u32 %v552_v27, %v208_v22  ;;  %v217_v36 = vshrl.u32 %v553_v29, %v208_v22 }
  0x52   : > { %v220_v37 = vshrl.u32 %v554_v31, %v208_v22  ;;  %v223_v39 = vshrl.u32 %v555_v38, %v208_v22  ;;  %vm226_vm3 = vcmp.lt.s32.totalorder %v206_v21, 2  ;;  %vm227_vm4 = vcmp.lt.s32.totalorder %v206_v21, 3 }
  0x53   : > { %v212_v41 = vor.u32 %v211_v34, %v210_v24  ;;  %v215_v42 = vor.u32 %v214_v35, %v213_v26  ;;  %v218_v43 = vor.u32 %v217_v36, %v216_v28 }
  0x54   : > { %v221_v44 = vor.u32 %v220_v37, %v219_v30  ;;  %v224_v45 = vor.u32 %v223_v39, %v222_v32 }
  0x55   : > { %v229_v46 = vsel %vm225_vm1, %v209_v33, %v212_v41  ;;  %v230_v47 = vsel %vm228_vm2, %v218_v43, 2102212464  ;;  %v233_v48 = vsel %vm225_vm1, %v212_v41, %v215_v42  ;;  %v237_v49 = vsel %vm225_vm1, %v215_v42, %v218_v43 }
  0x56   : > { %v231_v50 = vsel %vm227_vm4, %v215_v42, %v230_v47  ;;  %v234_v51 = vsel %vm228_vm2, %v221_v44, 920167782  ;;  %v238_v52 = vsel %vm228_vm2, %v224_v45, 1326507024 }
  0x57   : > { %v235_v53 = vsel %vm227_vm4, %v218_v43, %v234_v51  ;;  %v239_v54 = vsel %vm227_vm4, %v221_v44, %v238_v52  ;;  %v232_v55 = vsel %vm226_vm3, %v229_v46, %v231_v50 }
  0x58   : > { %v236_v56 = vsel %vm226_vm3, %v233_v48, %v235_v53  ;;  %v240_v57 = vsel %vm226_vm3, %v237_v49, %v239_v54  ;;  %v248_v62 = vmul.u32 %v241_v40, %v232_v55 }
  0x59   : > { %v673_v58 = vmul.u32.u64.low %v241_v40, %v240_v57  ;;  %v674_v59 = vmul.u32.u64.high %v241_v40, %v240_v57, %v673_v58  ;;  %v676_v60 = vmul.u32.u64.low %v241_v40, %v236_v56  ;;  %v677_v61 = vmul.u32.u64.high %v241_v40, %v236_v56, %v676_v60 }
  0x5b   : > { %vm250_vm5 = vc.u32 %v674_v59, %v676_v60  ;;  %v251_v63 = vadd.s32 1, %v677_v61  ;;  %v249_v10 = vadd.s32 %v676_v60, %v674_v59 }
  0x5d   : > { %v252_v0 = vsel %vm250_vm5, %v251_v63, %v677_v61 }
  0x5e   : > { %v253_v1 = vadd.s32 %v252_v0, %v248_v62 }
  0x60   : > { %v254_v2 = vadd.s32 536870912, %v253_v1 }
  0x62   : > { %v255_v3 = vshrl.u32 %v254_v2, 30 }
  0x64   : > { %v256_v4 = vshll.u32 %v255_v3, 30  ;;  %v279_v24 = vsub.s32 4, %v255_v3 }
  0x66   : > { %v257_v5 = vsub.s32 %v253_v1, %v256_v4  ;;  %v280_v27 = vsel %vm195_vm7, %v279_v24, %v255_v3 }
  0x67   : > { %v282_v30 = vsel %vm194_vm8, 0, %v280_v27 }
  0x68   : > { %v259_v6 = vsub.s32 0, %v257_v5  ;;  %v286_v31 = vadd.s32 3, %v282_v30 }
  0x6a   : > { %v382_v7 = vmin.u32 %v259_v6, %v257_v5  ;;  %v287_v32 = vand.u32 3, %v286_v31 }
  0x6c   : > { %v261_v8 = vclz %v382_v7  ;;  %vm292_vm9 = vcmp.eq.s32.totalorder %v287_v32, 2  ;;  %vm289_vm10 = vcmp.eq.s32.totalorder %v287_v32, 0  ;;  %vm288_vm11 = vcmp.lt.s32.totalorder %v287_v32, 2 }
  0x6e   : > { %v383_v9 = vadd.s32 4294967294, %v261_v8 }
  0x70   : > { %vm384_vm6 = vcmp.lt.s32.totalorder %v383_v9, 0 }
  0x71   : > { %v264_v12 = vsel %vm384_vm6, 0, %v383_v9 }
  0x72   : > { %v265_v13 = vsub.s32 32, %v264_v12  ;;  %v266_v15 = vshll.u32 %v257_v5, %v264_v12  ;;  %v269_v16 = vsub.s32 4294967266, %v264_v12 }
  0x74   : > { %v267_v17 = vshrl.u32 %v249_v10, %v265_v13  ;;  %v270_v18 = vadd.s32 127, %v269_v16 }
  0x76   : > { %v268_v19 = vor.u32 %v267_v17, %v266_v15  ;;  %v271_v20 = vshll.u32 %v270_v18, 23 }
  0x78   : > { %v272_v21 = vor.u32 4788187, %v271_v20  ;;  %v275_v22 = vcvt.s32.f32 %v268_v19 }
  0x7a   : > { %v273_v23 = vand.u32 2147483647, %v272_v21 }
  0x7c   : > { %v276_v25 = vmul.f32 %v275_v22, %v273_v23 }
  0x7e   : > { %v277_v26 = vxor.u32 2147483648, %v276_v25 }
  0x80   : > { %v278_v28 = vsel %vm195_vm7, %v277_v26, %v276_v25 }
  0x81   : > { %v281_v29 = vsel %vm194_vm8, %v667_v11, %v278_v28 }
  0x82   : > { %449 = vcosq.f32 %v281_v29 }
  0x83   : > { %451 = vsinq.f32 %v281_v29 }
  0x8c   : > { %v450_v33 = vpop.eup %449 }
  0x8d   : > { %v452_v34 = vpop.eup %451  ;;  %v293_v35 = vxor.u32 2147483648, %v450_v33 }
  0x8e   : > { %v290_v14 = vxor.u32 2147483648, %v452_v34 }
  0x8f   : > { %v294_v36 = vsel %vm292_vm9, %v293_v35, %v452_v34 }
  0x90   : > { %v291_v37 = vsel %vm289_vm10, %v450_v33, %v290_v14 }
  0x91   : > { %v295_v38 = vsel %vm288_vm11, %v291_v37, %v294_v36 }
  0x92   : > { %v296_v39 = vsel %vm285_vm12, nan, %v295_v38 }
  0x93   : > { %297 = vst [vmem:[%s161_s28] sm:$0xff] %v296_v39 }
  0x94   : > { %494 = shalt.err (!%p491_p4)
}
  0x95   : > { %s495_s11 = scalar_lea.hbm %s695_s6, 128  ;;  %s499_s20 = scalar_lea.hbm %s738_s3, 256 }
  0x96   : > { %p496_p7 = scmp.ne.s32.totalorder %s695_s6, %s495_s11  ;;  %p500_p13 = scmp.lt.u32.totalorder %s695_s6, %s738_s3 }
  0x97   : > { %p501_p1 = scmp.lt.u32.totalorder %s499_s20, %s495_s11  ;;  %p503_p5 = scmp.lt.u32.totalorder %s495_s11, %s695_s6 }
  0x98   : > { %p497_p8 = pnand %p496_p7, %p749_p6 }
  0x99   : > { %p502_p0 = por %p501_p1, %p500_p13 }
  0x9a   : > { %p498_p11 = pneg %p497_p8 }
  0x9b   : > { %p504_p9 = por %p503_p5, %p502_p0 }
  0x9d   : > { %p505_p10 = pnand %p504_p9, %p498_p11 }
  0x9f   : > { %508 = shalt.err (!%p505_p10)
}
  0xa0   : > { %397 = dma.vmem_to_hbm [thread:$0]  (%p749_p6), %s690_s29, 128, %s695_s6, %s299_s7  }
  0xa1 PF: > { %p409_p12 = scmp.ge.s32.totalorder %s547_s15, 2  ;;  %s324_s26 = sand.u32 1, %s535_s12  }
  0xa2   : > { %p750_p2 = scmp.ne.s32.totalorder %s743_s23, 0  ;;  %s325_s27 = scalar_lea.sflag [#allocation4], %s324_s26 }
  0xa4   : > { %p404_p3 = pnand %p409_p12, %p750_p2 }
  0xa6   : > { %530 = dma.done.wait (!%p404_p3), %s325_s27, 128  }
  0xa7   : > { %532 = vsyncadd (!%p404_p3), %s325_s27, 4294967168  ;;  %p14_p4 = scmp.ge.s32.totalorder %s602_s18, 4   ;;  %s751_s12 = smov %s539_s13 }
  0xa8   : > { %s752_s13 = smov %s543_s14  ;;  %s753_s14 = smov %s613_s21 }
  0xa9   : > { %s754_s15 = smov %s602_s18  ;;  %16 = sbr.rel (!%p14_p4) target bundleno = 4 (0x4), region = 69 }
  0xb0   :  { %330 = vsyncpa [#allocation3], 1 }
  0xb1   :  { %332 = vsyncpa [#allocation3 + $0x1], 1 }
  0xb2   :  { %333 = vsyncpa [#allocation4], 1 }
  0xb3   :  { %335 = vsyncpa [#allocation4 + $0x1], 1 }

</bundles_post_ra>
